<compile_context>
chip_gen: v5e
topology: v5e:2x2
jax: 0.10.0
libtpu: 0.0.40
codegen_flags: <defaults>
</compile_context>

<pallas_src>
import functools
import numpy as np
import jax
import jax.numpy as jnp
from jax.experimental import pallas as pl
from jax.experimental.pallas import tpu as pltpu

_MASK_SENTINEL = 1e30  # finite (avoids 0*inf through the quantile matmul)


def _round_up(x, m):
    return ((x + m - 1) // m) * m


def _vmem_capacity_bytes():
    # Generation-aware physical VMEM (128 MiB on v5e/v6e, 64 MiB per TC on v7x).
    try:
        return int(pltpu.get_tpu_info().vmem_capacity_bytes)
    except Exception:
        return 64 << 20  # conservative fallback (v7x size)


# ---------------------------------------------------------------------------
# Kernel 1: fused continuous-WL iterations + sliced random projection.
# Grid over packed node tiles; `tb` tiles folded per grid step; node-on-lane layout.
# ---------------------------------------------------------------------------
def _wl_project_kernel(x_ref, a_ref, invdeg_ref, theta_ref, out_ref, hcat_ref, *,
                       num_wl_iterations, step):
    # x_ref:      (TB, d, NB)  f32      node features, node-on-lane
    # a_ref:      (TB, NB, NB) bf16/f32 0/1 A^T (block-diagonal per packed tile)
    # invdeg_ref: (TB, 1, NB)  f32      1/max(deg,1) per node lane
    # theta_ref:  (P, Dcat)    f32      resident projection directions
    # out_ref:    (TB, P, NB)  f32      projections (lane-dense stores)
    # hcat_ref:   (Dcat, NB)   f32      scratch: concat([h^0 .. h^L])
    tb, d, _ = x_ref.shape
    for ti in range(tb):                       # fold several packed tiles per step
        h = x_ref[ti]                          # (d, NB) f32
        a = a_ref[ti]                          # (NB, NB) 0/1
        inv_deg = invdeg_ref[ti]               # (1, NB) f32
        hcat_ref[0:d, :] = h
        for l in range(1, num_wl_iterations + 1):
            for _ in range(step):              # step=1 -> no skipped iterations
                # neighbor mean = (h @ A^T) column-scaled by 1/deg (exact f32 VPU mul);
                # 0/1 A rides the fast bf16 MXU path when a_dtype=bfloat16.
                nbr = jnp.dot(h.astype(a_ref.dtype), a,
                              preferred_element_type=jnp.float32) * inv_deg
                h = 0.5 * (h + nbr)            # isolated nodes: zero nbr -> 0.5*h
            hcat_ref[l * d:(l + 1) * d, :] = h
        # One (P,Dcat)@(Dcat,NB) projection instead of (L+1) K=d matmuls.
        out_ref[ti] = jnp.dot(theta_ref[...], hcat_ref[...],
                              preferred_element_type=jnp.float32)


def wl_project(x_t, a01_t, inv_deg, theta, *, num_wl_iterations, step=1,
               tiles_per_step=8):
    """x_t: (T, d, NB) f32, a01_t: (T, NB, NB) 0/1 (bf16 or f32),
    inv_deg: (T, 1, NB) f32, theta: (P, d*(L+1)) f32.
    Returns projections (T, P, NB) f32 for the packed node tiles."""
    T, d, NB = x_t.shape
    P, Dcat = theta.shape
    assert Dcat == d * (num_wl_iterations + 1)
    a_item = a01_t.dtype.itemsize

    cap = _vmem_capacity_bytes()
    usable = (cap * 3) // 4                    # headroom for compiler scratch (v7x-safe)
    theta_bytes = P * Dcat * 4
    scratch_bytes = Dcat * NB * 4

    def per_step_bytes(tb):
        return tb * (NB * NB * a_item + d * NB * 4 + NB * 4 + P * NB * 4)

    tb = max(1, min(tiles_per_step, T))
    while tb > 1 and 2 * per_step_bytes(tb) + theta_bytes + scratch_bytes > usable:
        tb //= 2
    assert 2 * per_step_bytes(1) + theta_bytes + scratch_bytes <= usable, (
        "one (NB,NB) adjacency block exceeds the VMEM budget; "
        "TODO(synk): add a reduction-panel grid axis over A for very large graphs")

    Tp = _round_up(T, tb)
    if Tp != T:                                # pad with empty (all-zero) tiles
        pad = Tp - T
        x_t = jnp.concatenate([x_t, jnp.zeros((pad, d, NB), x_t.dtype)], axis=0)
        a01_t = jnp.concatenate([a01_t, jnp.zeros((pad, NB, NB), a01_t.dtype)], axis=0)
        inv_deg = jnp.concatenate(
            [inv_deg, jnp.ones((pad, 1, NB), inv_deg.dtype)], axis=0)

    vmem_limit = int(max(16 << 20,
                         min(usable, 2 * per_step_bytes(tb) + theta_bytes
                             + scratch_bytes + (4 << 20))))

    flops = int(Tp * (num_wl_iterations * step * 2 * d * NB * NB + 2 * P * Dcat * NB))
    bytes_accessed = int(Tp * per_step_bytes(1) + theta_bytes)

    kernel = functools.partial(_wl_project_kernel,
                               num_wl_iterations=num_wl_iterations, step=step)
    out = pl.pallas_call(
        kernel,
        out_shape=jax.ShapeDtypeStruct((Tp, P, NB), jnp.float32),
        grid_spec=pltpu.PrefetchScalarGridSpec(
            num_scalar_prefetch=0,
            grid=(Tp // tb,),
            in_specs=[
                pl.BlockSpec((tb, d, NB), lambda t: (t, 0, 0)),
                # TODO(synk): pipeline_mode=pl.Buffered(3) on the A spec for v5e's lower HBM BW.
                pl.BlockSpec((tb, NB, NB), lambda t: (t, 0, 0)),
                pl.BlockSpec((tb, 1, NB), lambda t: (t, 0, 0)),
                pl.BlockSpec((P, Dcat), lambda t: (0, 0)),        # theta resident
            ],
            out_specs=pl.BlockSpec((tb, P, NB), lambda t: (t, 0, 0)),
            scratch_shapes=[pltpu.VMEM((Dcat, NB), jnp.float32)],
        ),
        compiler_params=pltpu.CompilerParams(
            # TODO(synk): use pltpu.CORE_PARALLEL on v7x (2 TCs) once gated on chip version.
            dimension_semantics=("parallel",),
            vmem_limit_bytes=vmem_limit),
        cost_estimate=pl.CostEstimate(flops=flops, transcendentals=0,
                                      bytes_accessed=bytes_accessed),
    )(x_t, a01_t, inv_deg, theta)
    return out[:T]


# ---------------------------------------------------------------------------
# Kernel 2: per-graph quantile linear interpolation.
# lo/hi/frac arrive as tiny (G,1,Q) VMEM tensors (no 2-D SMEM padding blowup);
# a (NBs,Q) lerp-weight matrix is built from a 2-D iota and one small MXU matmul
# replaces the per-quantile mask/reduce/place passes.  Graphs folded per step.
# ---------------------------------------------------------------------------
def _quantile_kernel(lo_ref, hi_ref, frac_ref, s_ref, o_ref):
    gb, _, nbs = s_ref.shape
    q_dim = o_ref.shape[2]
    niota = jax.lax.broadcasted_iota(jnp.int32, (nbs, q_dim), 0)
    for gi in range(gb):                          # graphs folded per grid step
        lo = lo_ref[gi]                           # (1, Q) int32
        hi = hi_ref[gi]                           # (1, Q) int32
        fr = frac_ref[gi]                         # (1, Q) f32
        w = (jnp.where(niota == lo, 1.0 - fr, 0.0)
             + jnp.where(niota == hi, fr, 0.0))   # (NBs, Q) lerp weights
        o_ref[gi] = jnp.dot(s_ref[gi], w, preferred_element_type=jnp.float32)


def quantile_lerp(lo, hi, frac, sorted_vals, *, graphs_per_step=8):
    G, Q = lo.shape
    _, P, NBs = sorted_vals.shape
    gb = max(1, min(graphs_per_step, G))
    Gp = _round_up(G, gb)
    if Gp != G:
        pad = Gp - G
        sorted_vals = jnp.concatenate(
            [sorted_vals, jnp.zeros((pad, P, NBs), sorted_vals.dtype)], axis=0)
        lo = jnp.concatenate([lo, jnp.zeros((pad, Q), lo.dtype)], axis=0)
        hi = jnp.concatenate([hi, jnp.zeros((pad, Q), hi.dtype)], axis=0)
        frac = jnp.concatenate([frac, jnp.zeros((pad, Q), frac.dtype)], axis=0)
    lo3, hi3, fr3 = (a.reshape(Gp, 1, Q) for a in (lo, hi, frac))

    flops = int(Gp * (2 * P * NBs * Q + 4 * NBs * Q))
    bytes_accessed = int(Gp * (P * NBs * 4 + P * Q * 4 + 3 * Q * 4))
    out = pl.pallas_call(
        _quantile_kernel,
        out_shape=jax.ShapeDtypeStruct((Gp, P, Q), jnp.float32),
        grid_spec=pltpu.PrefetchScalarGridSpec(
            num_scalar_prefetch=0,
            grid=(Gp // gb,),
            in_specs=[
                pl.BlockSpec((gb, 1, Q), lambda i: (i, 0, 0)),
                pl.BlockSpec((gb, 1, Q), lambda i: (i, 0, 0)),
                pl.BlockSpec((gb, 1, Q), lambda i: (i, 0, 0)),
                pl.BlockSpec((gb, P, NBs), lambda i: (i, 0, 0)),
            ],
            out_specs=pl.BlockSpec((gb, P, Q), lambda i: (i, 0, 0)),
        ),
        compiler_params=pltpu.CompilerParams(dimension_semantics=("parallel",)),
        cost_estimate=pl.CostEstimate(flops=flops, transcendentals=0,
                                      bytes_accessed=bytes_accessed),
    )(lo3, hi3, fr3, sorted_vals)
    return out[:G]


# ---------------------------------------------------------------------------
# Host-side glue: block-diagonal packing of small graphs into 128-lane node tiles.
# ---------------------------------------------------------------------------
def build_packed_graph_tiles(x, edge_index, batch, num_graphs, *, lane_align=8,
                             a_dtype=jnp.bfloat16):
    """Packs graphs block-diagonally into shared node tiles (node-on-lane layout).
    Returns: x_t (T,d,NB) f32, a01_t (T,NB,NB) 0/1 a_dtype, inv_deg (T,1,NB) f32,
             src_idx (G,NBs) int32 (flattened lane index per graph node),
             counts (G,) int32."""
    x = np.asarray(x, np.float32)
    batch = np.asarray(batch)
    src, dst = np.asarray(edge_index[0]), np.asarray(edge_index[1])
    N, d = x.shape
    counts = np.bincount(batch, minlength=num_graphs).astype(np.int32)
    aligned = ((counts + lane_align - 1) // lane_align) * lane_align
    NB = _round_up(max(int(aligned.max()) if num_graphs else 1, 1), 128)

    # Greedy first-fit packing of graphs into NB-lane tiles.
    tile_of = np.zeros(num_graphs, np.int32)
    off_of = np.zeros(num_graphs, np.int32)
    cur_tile, cur_used = 0, 0
    for g in range(num_graphs):
        sz = int(aligned[g])
        if sz == 0:
            tile_of[g], off_of[g] = cur_tile, cur_used
            continue
        if cur_used + sz > NB:
            cur_tile, cur_used = cur_tile + 1, 0
        tile_of[g], off_of[g] = cur_tile, cur_used
        cur_used += sz
    T = cur_tile + 1

    NBs = _round_up(max(int(counts.max()) if num_graphs else 1, 1), 128)
    x_t = np.zeros((T, d, NB), np.float32)
    a01 = np.zeros((T, NB, NB), np.float32)
    inv_deg = np.ones((T, 1, NB), np.float32)
    src_idx = np.zeros((num_graphs, NBs), np.int64)
    for g in range(num_graphs):
        idx = np.where(batch == g)[0]
        n_g = idx.size
        if n_g == 0:
            continue  # empty graph: embedding is meaningless (torch.quantile would error)
        t, o = int(tile_of[g]), int(off_of[g])
        loc = -np.ones(N, np.int64)
        loc[idx] = np.arange(n_g)
        e = batch[src] == g                           # edges are intra-graph
        A = np.zeros((n_g, n_g), np.float32)
        A[loc[src[e]], loc[dst[e]]] = 1.0             # duplicates collapse (as torch path)
        a01[t, o:o + n_g, o:o + n_g] = A.T            # 0/1 A^T block (exact in bf16)
        inv_deg[t, 0, o:o + n_g] = 1.0 / np.maximum(A.sum(axis=1), 1.0)
        x_t[t, :, o:o + n_g] = x[idx].T
        src_idx[g, :n_g] = t * NB + o + np.arange(n_g)
    return (jnp.asarray(x_t), jnp.asarray(a01, dtype=a_dtype), jnp.asarray(inv_deg),
            jnp.asarray(src_idx, dtype=jnp.int32), jnp.asarray(counts))


def quantile_indices(counts, num_quantiles):
    q = jnp.linspace(0.0, 1.0, num_quantiles)
    cnt = jnp.maximum(counts.astype(jnp.int32), 1)     # empty graphs clamp to index 0
    pos = q[None, :] * (cnt[:, None] - 1).astype(jnp.float32)     # (G, Q)
    lo = jnp.floor(pos).astype(jnp.int32)
    hi = jnp.minimum(lo + 1, cnt[:, None] - 1)
    frac = pos - lo.astype(jnp.float32)
    return lo, hi, frac


def swwl_forward(x_t, a01_t, inv_deg, theta, src_idx, counts, *,
                 num_wl_iterations, num_quantiles, step=1,
                 tiles_per_step=8, graphs_per_step=8):
    T, _, NB = x_t.shape
    G, NBs = src_idx.shape
    P = theta.shape[0]
    proj = wl_project(x_t, a01_t, inv_deg, theta,
                      num_wl_iterations=num_wl_iterations, step=step,
                      tiles_per_step=tiles_per_step)              # (T, P, NB)
    # Unpack per-graph lanes from the packed tiles (tiny vs adjacency traffic) and
    # push out-of-graph lanes to +sentinel so the sort ranks them last.
    proj_nodes = jnp.transpose(proj, (0, 2, 1)).reshape(T * NB, P)
    per_graph = jnp.take(proj_nodes, src_idx.reshape(-1), axis=0).reshape(G, NBs, P)
    lane = jnp.arange(NBs, dtype=jnp.int32)[None, :, None]
    per_graph = jnp.where(lane < counts[:, None, None], per_graph, _MASK_SENTINEL)
    vals = jnp.transpose(per_graph, (0, 2, 1))                    # (G, P, NBs)
    # TODO(synk): lax.sort has no Pallas TPU lowering; the per-graph node sort stays
    # in plain XLA (invalid lanes already carry the +sentinel).
    sorted_vals = jnp.sort(vals, axis=-1)
    lo, hi, frac = quantile_indices(counts, num_quantiles)
    quant = quantile_lerp(lo, hi, frac, sorted_vals,
                          graphs_per_step=graphs_per_step)        # (G, P, Q)
    return quant.reshape(G, P * num_quantiles)     # projection-major / quantile-minor


# ---------------------------------------------------------------------------
if __name__ == "__main__":
    key = jax.random.PRNGKey(0)

    # Module hyperparameters (SWWL_Encoder.__init__)
    dim_attributes = 4
    num_wl_iterations = 2      # L  -> concat size d*(L+1)
    num_projections = 8        # P
    num_quantiles = 4          # Q
    step = 1                   # step=1 -> no skipped iterations

    # Synthetic batched graph data: 2 graphs of 16 nodes each (PyG-style flat batch).
    nodes_per_graph = 16
    num_graphs = 2
    N = nodes_per_graph * num_graphs
    batch = np.repeat(np.arange(num_graphs), nodes_per_graph)

    k_x, k_t = jax.random.split(key, 2)
    # data.x is wider than dim_attributes; forward slices the first d columns.
    x_full = jax.random.normal(k_x, (N, dim_attributes + 2), dtype=jnp.float32)
    x = np.asarray(x_full[:, :dim_attributes])

    # edge_index: ring within each graph + a few deterministic chords (both directions).
    src, dst = [], []
    for g in range(num_graphs):
        off = g * nodes_per_graph
        for i in range(nodes_per_graph):
            j = (i + 1) % nodes_per_graph
            src += [off + i, off + j]; dst += [off + j, off + i]
        for i in range(0, nodes_per_graph, 4):
            j = (i + 5) % nodes_per_graph
            src += [off + i, off + j]; dst += [off + j, off + i]
    edge_index = np.stack([np.array(src), np.array(dst)])

    # Deterministic SW parameters: unit-norm random directions.
    D_cat = dim_attributes * (num_wl_iterations + 1)
    theta = jax.random.normal(k_t, (num_projections, D_cat), dtype=jnp.float32)
    theta = theta / jnp.linalg.norm(theta, axis=1, keepdims=True)

    # ---- Glue: packed block-diagonal node tiles (f32 0/1 adjacency for exact check)
    x_t, a01_f32, inv_deg, src_idx, counts = build_packed_graph_tiles(
        x, edge_index, batch, num_graphs, a_dtype=jnp.float32)

    # ---- Exact f32-MXU path ------------------------------------------------------
    emb_f32 = swwl_forward(
        x_t, a01_f32, inv_deg, theta, src_idx, counts,
        num_wl_iterations=num_wl_iterations, num_quantiles=num_quantiles, step=step)
    emb_f32 = jax.block_until_ready(emb_f32)

    # ---- Pure NumPy reference ----------------------------------------------------
    A = np.zeros((N, N), dtype=np.float32)
    A[edge_index[0], edge_index[1]] = 1.0
    deg = A.sum(axis=1, keepdims=True)
    A_norm = A / np.maximum(deg, 1.0)
    h = x
    feats = [h]
    for _ in range(num_wl_iterations):
        h = 0.5 * (h + A_norm @ h)
        feats.append(h)
    x_cat = np.concatenate(feats, axis=1)                 # (N, d*(L+1))
    proj_ref = x_cat @ np.asarray(theta).T                # (N, P)
    q_np = np.linspace(0.0, 1.0, num_quantiles)
    emb_ref = []
    for g in range(num_graphs):
        vals = proj_ref[batch == g]
        qv = np.quantile(vals, q_np, axis=0)              # (Q, P), linear interpolation
        emb_ref.append(qv.T.reshape(-1))                  # projection-major
    emb_ref = np.stack(emb_ref)

    assert emb_f32.shape == (num_graphs, num_projections * num_quantiles)
    np.testing.assert_allclose(np.asarray(emb_f32), emb_ref, rtol=1e-4, atol=1e-4)

    # ---- Default fast path: bf16 0/1 adjacency (exact cast), f32 1/deg on the VPU -
    a01_bf16 = a01_f32.astype(jnp.bfloat16)
    emb_bf16 = swwl_forward(
        x_t, a01_bf16, inv_deg, theta, src_idx, counts,
        num_wl_iterations=num_wl_iterations, num_quantiles=num_quantiles, step=step)
    emb_bf16 = jax.block_until_ready(emb_bf16)
    np.testing.assert_allclose(np.asarray(emb_bf16), emb_ref, rtol=5e-2, atol=5e-2)

    print("KERNEL_OK")
</pallas_src>

<mosaic_0001>
module attributes {stable_mosaic.version = 11 : i64} {
  func.func @_wl_project_kernel(%arg0: i32, %arg1: memref<1x4x128xf32, #tpu.memory_space<vmem>>, %arg2: memref<1x128x128xf32, #tpu.memory_space<vmem>>, %arg3: memref<1x1x128xf32, #tpu.memory_space<vmem>>, %arg4: memref<8x12xf32, #tpu.memory_space<vmem>>, %arg5: memref<1x8x128xf32, #tpu.memory_space<vmem>>, %arg6: memref<12x128xf32, #tpu.memory_space<vmem>>) attributes {dimension_semantics = [#tpu.dimension_semantics<parallel>], iteration_bounds = array<i64: 1>, scalar_prefetch = 0 : i64, scratch_operands = 1 : i64, tpu.core_type = #tpu.core_type<tc>, window_params = [{transform_indices = @transform_0, window_bounds = array<i64: 1, 4, 128>}, {transform_indices = @transform_1, window_bounds = array<i64: 1, 128, 128>}, {transform_indices = @transform_2, window_bounds = array<i64: 1, 1, 128>}, {pipeline_mode = #tpu.pipeline_mode<synchronous>, transform_indices = @transform_3, window_bounds = array<i64: 8, 12>}, {transform_indices = @transform_4, window_bounds = array<i64: 1, 8, 128>}]} {
    %c0 = arith.constant 0 : index
    %c0_0 = arith.constant 0 : index
    %c0_1 = arith.constant 0 : index
    %0 = vector.load %arg1[%c0, %c0_0, %c0_1] : memref<1x4x128xf32, #tpu.memory_space<vmem>>, vector<1x4x128xf32>
    %1 = vector.shape_cast %0 : vector<1x4x128xf32> to vector<4x128xf32>
    %c0_2 = arith.constant 0 : index
    %c0_3 = arith.constant 0 : index
    %c0_4 = arith.constant 0 : index
    %2 = vector.load %arg2[%c0_2, %c0_3, %c0_4] : memref<1x128x128xf32, #tpu.memory_space<vmem>>, vector<1x128x128xf32>
    %3 = vector.shape_cast %2 : vector<1x128x128xf32> to vector<128x128xf32>
    %c0_5 = arith.constant 0 : index
    %c0_6 = arith.constant 0 : index
    %c0_7 = arith.constant 0 : index
    %4 = vector.load %arg3[%c0_5, %c0_6, %c0_7] : memref<1x1x128xf32, #tpu.memory_space<vmem>>, vector<1x1x128xf32>
    %5 = vector.shape_cast %4 : vector<1x1x128xf32> to vector<1x128xf32>
    %c0_8 = arith.constant 0 : index
    %c0_9 = arith.constant 0 : index
    %6 = vector.load %arg6[%c0_8, %c0_9] : memref<12x128xf32, #tpu.memory_space<vmem>>, vector<4x128xf32>
    tpu.vector_store %arg6[%c0_8, %c0_9], %1 {strides = array<i32>} : memref<12x128xf32, #tpu.memory_space<vmem>>, vector<4x128xf32>,
    %cst = arith.constant dense<0.000000e+00> : vector<4x128xf32>
    %7 = tpu.matmul %1, %3, %cst {dimension_numbers = #tpu.dot_dimension_numbers<[1], [0], [0], [1], [0, 0, 1, 1], [], []>} : vector<4x128xf32>, vector<128x128xf32>, vector<4x128xf32> -> vector<4x128xf32>
    %8 = vector.broadcast %5 : vector<1x128xf32> to vector<4x128xf32>
    %9 = arith.mulf %7, %8 : vector<4x128xf32>
    %10 = arith.addf %1, %9 : vector<4x128xf32>
    %cst_10 = arith.constant 5.000000e-01 : f32
    %11 = vector.broadcast %cst_10 : f32 to vector<4x128xf32>
    %12 = arith.mulf %11, %10 : vector<4x128xf32>
    %c4 = arith.constant 4 : index
    %c0_11 = arith.constant 0 : index
    %13 = vector.load %arg6[%c4, %c0_11] : memref<12x128xf32, #tpu.memory_space<vmem>>, vector<4x128xf32>
    tpu.vector_store %arg6[%c4, %c0_11], %12 {strides = array<i32>} : memref<12x128xf32, #tpu.memory_space<vmem>>, vector<4x128xf32>,
    %cst_12 = arith.constant dense<0.000000e+00> : vector<4x128xf32>
    %14 = tpu.matmul %12, %3, %cst_12 {dimension_numbers = #tpu.dot_dimension_numbers<[1], [0], [0], [1], [0, 0, 1, 1], [], []>} : vector<4x128xf32>, vector<128x128xf32>, vector<4x128xf32> -> vector<4x128xf32>
    %15 = vector.broadcast %5 : vector<1x128xf32> to vector<4x128xf32>
    %16 = arith.mulf %14, %15 : vector<4x128xf32>
    %17 = arith.addf %12, %16 : vector<4x128xf32>
    %cst_13 = arith.constant 5.000000e-01 : f32
    %18 = vector.broadcast %cst_13 : f32 to vector<4x128xf32>
    %19 = arith.mulf %18, %17 : vector<4x128xf32>
    %c8 = arith.constant 8 : index
    %c0_14 = arith.constant 0 : index
    %20 = vector.load %arg6[%c8, %c0_14] : memref<12x128xf32, #tpu.memory_space<vmem>>, vector<4x128xf32>
    tpu.vector_store %arg6[%c8, %c0_14], %19 {strides = array<i32>} : memref<12x128xf32, #tpu.memory_space<vmem>>, vector<4x128xf32>,
    %c0_15 = arith.constant 0 : index
    %c0_16 = arith.constant 0 : index
    %21 = vector.load %arg4[%c0_15, %c0_16] : memref<8x12xf32, #tpu.memory_space<vmem>>, vector<8x12xf32>
    %c0_17 = arith.constant 0 : index
    %c0_18 = arith.constant 0 : index
    %22 = vector.load %arg6[%c0_17, %c0_18] : memref<12x128xf32, #tpu.memory_space<vmem>>, vector<12x128xf32>
    %cst_19 = arith.constant dense<0.000000e+00> : vector<8x128xf32>
    %23 = tpu.matmul %21, %22, %cst_19 {dimension_numbers = #tpu.dot_dimension_numbers<[1], [0], [0], [1], [0, 0, 1, 1], [], []>} : vector<8x12xf32>, vector<12x128xf32>, vector<8x128xf32> -> vector<8x128xf32>
    %c0_20 = arith.constant 0 : index
    %c0_21 = arith.constant 0 : index
    %c0_22 = arith.constant 0 : index
    %24 = vector.load %arg5[%c0_20, %c0_21, %c0_22] : memref<1x8x128xf32, #tpu.memory_space<vmem>>, vector<1x8x128xf32>
    %25 = vector.shape_cast %24 : vector<1x8x128xf32> to vector<8x128xf32>
    %26 = vector.shape_cast %23 : vector<8x128xf32> to vector<1x8x128xf32>
    tpu.vector_store %arg5[%c0_20, %c0_21, %c0_22], %26 {strides = array<i32>} : memref<1x8x128xf32, #tpu.memory_space<vmem>>, vector<1x8x128xf32>,
    return
  }
  func.func @transform_0(%arg0: i32) -> (i32, i32, i32) {
    %c0_i32 = arith.constant 0 : i32
    %c0_i32_0 = arith.constant 0 : i32
    %c0_i32_1 = arith.constant 0 : i32
    return %arg0, %c0_i32, %c0_i32_0 : i32, i32, i32
  }
  func.func @transform_1(%arg0: i32) -> (i32, i32, i32) {
    %c0_i32 = arith.constant 0 : i32
    %c0_i32_0 = arith.constant 0 : i32
    %c0_i32_1 = arith.constant 0 : i32
    return %arg0, %c0_i32, %c0_i32_0 : i32, i32, i32
  }
  func.func @transform_2(%arg0: i32) -> (i32, i32, i32) {
    %c0_i32 = arith.constant 0 : i32
    %c0_i32_0 = arith.constant 0 : i32
    %c0_i32_1 = arith.constant 0 : i32
    return %arg0, %c0_i32, %c0_i32_0 : i32, i32, i32
  }
  func.func @transform_3(%arg0: i32) -> (i32, i32) {
    %c0_i32 = arith.constant 0 : i32
    %c0_i32_0 = arith.constant 0 : i32
    %c0_i32_1 = arith.constant 0 : i32
    return %c0_i32, %c0_i32_0 : i32, i32
  }
  func.func @transform_4(%arg0: i32) -> (i32, i32, i32) {
    %c0_i32 = arith.constant 0 : i32
    %c0_i32_0 = arith.constant 0 : i32
    %c0_i32_1 = arith.constant 0 : i32
    return %arg0, %c0_i32, %c0_i32_0 : i32, i32, i32
  }
}

</mosaic_0001>

<bundles_post_ra>
// kernel: tpu_custom_call.1
= control target key start
LH: loop header
LB: loop body
LE: loop exit
PB: predicated region body
PF: predicated region fallthrough
CT: control target
= control target key end

     0   :  { %9 = vsyncpa [#allocation4], 0  ;;  %s338_s0 = inlined_call_operand.hbm [shape: f32[1,4,128], index: 0, kind: input, shape index: {}]   ;;  %s339_s1 = inlined_call_operand.hbm [shape: f32[1,128,128], index: 1, kind: input, shape index: {}]   ;;  %s340_s2 = inlined_call_operand.vmem [shape: f32[1,1,128], index: 2, kind: input, shape index: {}]   ;;  %s341_s3 = inlined_call_operand.hbm [shape: f32[8,12], index: 3, kind: input, shape index: {}]   ;;  %s342_s4 = inlined_call_operand.hbm [shape: f32[1,8,128], index: 4, kind: output, shape index: {}]  }
   0x1   :  { %10 = vsyncpa [#allocation7], 0  ;;  %s27_s17 = sshll.u32 %s339_s1, 4  ;;  %s28_s17 = int_to_ptr.hbm [resolvable:$true] %s27_s17 }
   0x2   :  { %11 = vsyncpa [#allocation5], 0  ;;  %s292_s18 = smov [#allocation6]   ;;  %s17_s22 = sshll.u32 %s338_s0, 4  ;;  %s18_s22 = int_to_ptr.hbm [resolvable:$true] %s17_s22 }
   0x3   :  { %s29_s19 = sshll.u32 %s292_s18, 4  ;;  %s293_s23 = smov 128   ;;  %s30_s19 = int_to_ptr.vmem [resolvable:$true] %s29_s19 }
   0x4   :  { %s294_s24 = smov 8   ;;  %s295_s25 = smov [#allocation3]  }
   0x5   :  { %35 = dma.hbm_to_vmem [thread:$0]  %s28_s17, 2048, %s30_s19, [#allocation7], %s293_s23, %s293_s23, %s294_s24  }
   0x6   :  { %s19_s26 = sshll.u32 %s295_s25, 4  ;;  %s43_s29 = sshll.u32 %s341_s3, 4  ;;  %s20_s26 = int_to_ptr.vmem [resolvable:$true] %s19_s26  ;;  %s44_s29 = int_to_ptr.hbm [resolvable:$true] %s43_s29 }
   0x7   :  { %22 = dma.hbm_to_vmem [thread:$0]  %s18_s22, 64, %s20_s26, [#allocation4]  }
   0x8   :  { %s296_s1 = smov [#allocation8]  }
   0x9   :  { %s45_s30 = sshll.u32 %s296_s1, 4  ;;  %s46_s30 = int_to_ptr.vmem [resolvable:$true] %s45_s30 }
   0xa   :  { %48 = dma.hbm_to_vmem [thread:$0]  %s44_s29, 128, %s46_s30, [#allocation7]  }
   0xb   :  { %286 = dma.done.wait [#allocation4], 64  }
   0xc   :  { %287 = vsyncadd [#allocation4], 4294967232 }
   0xd   :  { %288 = dma.done.wait [#allocation7], 2176  }
   0xe   :  { %289 = vsyncadd [#allocation7], 4294965120  ;;  %v77_v0 = vld [vmem:[#allocation6 + $0x78] sm:$0xff]  ;;  %v76_v1 = vld [vmem:[#allocation6 + $0x70] sm:$0xff]  ;;  %vm138_vm0 = vcmask 1043456   ;;  %vm134_vm1 = vcmask 97280  }
   0xf   :  { %80 = vmatpush.msra.mxu0 %v77_v0  ;;  %107 = vmatpush.msra.mxu1 %v77_v0  ;;  %v75_v2 = vld [vmem:[#allocation6 + $0x68] sm:$0xff]  ;;  %v74_v3 = vld [vmem:[#allocation6 + $0x60] sm:$0xff]  ;;  %v61_v4 = vld [vmem:[#allocation3] sm:$0xf]  ;;  %s170_s8 = sshll.u32 %s342_s4, 4  ;;  %s171_s8 = int_to_ptr.hbm [resolvable:$true] %s170_s8 }
  0x10   :  { %v73_v5 = vld [vmem:[#allocation6 + $0x58] sm:$0xff]  ;;  %79 = vst [vmem:[#allocation2] sm:$0xf] %v61_v4  ;;  %v72_v6 = vld [vmem:[#allocation6 + $0x50] sm:$0xff]  ;;  %v71_v7 = vld [vmem:[#allocation6 + $0x48] sm:$0xff] }
  0x11   :  { %81 = vmatpush.msra.mxu0 %v76_v1  ;;  %108 = vmatpush.msra.mxu1 %v76_v1  ;;  %v70_v8 = vld [vmem:[#allocation6 + $0x40] sm:$0xff]  ;;  %v69_v9 = vld [vmem:[#allocation6 + $0x38] sm:$0xff]  ;;  %v68_v10 = vld [vmem:[#allocation6 + $0x30] sm:$0xff] }
  0x12   :  { %v67_v11 = vld [vmem:[#allocation6 + $0x28] sm:$0xff]  ;;  %v66_v12 = vld [vmem:[#allocation6 + $0x20] sm:$0xff]  ;;  %v65_v13 = vld [vmem:[#allocation6 + $0x18] sm:$0xff] }
  0x13   :  { %82 = vmatpush.msra.mxu0 %v75_v2  ;;  %109 = vmatpush.msra.mxu1 %v75_v2  ;;  %v64_v14 = vld [vmem:[#allocation6 + $0x10] sm:$0xff]  ;;  %v63_v15 = vld [vmem:[#allocation6 + $0x8] sm:$0xff]  ;;  %v62_v16 = vld [vmem:[#allocation6] sm:$0xff] }
  0x14   :  { %v189_v17 = vld [vmem:[%s340_s2] ss:$0 sm:$0xff]  ;;  %v131_v27 = vld [vmem:[#allocation8] sm:$0xff]  ;;  %s297_s2 = smov [#allocation9]  }
  0x15   :  { %83 = vmatpush.msra.mxu0 %v74_v3  ;;  %110 = vmatpush.msra.mxu1 %v74_v3  ;;  %s168_s5 = sshll.u32 %s297_s2, 4  ;;  %s169_s5 = int_to_ptr.vmem [resolvable:$true] %s168_s5 }
  0x17   :  { %84 = vmatpush.msra.mxu0 %v73_v5  ;;  %111 = vmatpush.msra.mxu1 %v73_v5 }
  0x19   :  { %85 = vmatpush.msra.mxu0 %v72_v6  ;;  %112 = vmatpush.msra.mxu1 %v72_v6 }
  0x1b   :  { %86 = vmatpush.msra.mxu0 %v71_v7  ;;  %113 = vmatpush.msra.mxu1 %v71_v7 }
  0x1d   :  { %87 = vmatpush.msra.mxu0 %v70_v8  ;;  %114 = vmatpush.msra.mxu1 %v70_v8 }
  0x1f   :  { %88 = vmatpush.msra.mxu0 %v69_v9  ;;  %115 = vmatpush.msra.mxu1 %v69_v9 }
  0x21   :  { %89 = vmatpush.msra.mxu0 %v68_v10  ;;  %116 = vmatpush.msra.mxu1 %v68_v10 }
  0x23   :  { %90 = vmatpush.msra.mxu0 %v67_v11  ;;  %117 = vmatpush.msra.mxu1 %v67_v11 }
  0x25   :  { %91 = vmatpush.msra.mxu0 %v66_v12  ;;  %118 = vmatpush.msra.mxu1 %v66_v12 }
  0x27   :  { %92 = vmatpush.msra.mxu0 %v65_v13  ;;  %119 = vmatpush.msra.mxu1 %v65_v13 }
  0x29   :  { %93 = vmatpush.msra.mxu0 %v64_v14  ;;  %120 = vmatpush.msra.mxu1 %v64_v14 }
  0x2b   :  { %94 = vmatpush.msra.mxu0 %v63_v15  ;;  %121 = vmatpush.msra.mxu1 %v63_v15 }
  0x2d   :  { %95 = vmatpush.msra.mxu0 %v62_v16  ;;  %122 = vmatpush.msra.mxu1 %v62_v16 }
  0x2e   :  { %96 = vmatmul.f32.vlgmr.msra.gmra.mxu0 %v61_v4 }
  0xab   :  { %v97_v18 = vpop.f32.mrf.mxu0 }
  0xac   :  { %v103_v19 = vmul.f32 %v189_v17, %v97_v18 }
  0xae   :  { %v104_v20 = vadd.f32 %v103_v19, %v61_v4 }
  0xb0   :  { %v105_v21 = vmul.f32 0.5, %v104_v20 }
  0xb2   :  { %106 = vst [vmem:[#allocation2 + $0x4] sm:$0xf] %v105_v21  ;;  %123 = vmatmul.f32.vlgmr.msra.gmra.mxu1 %v105_v21 }
  0xb9   :  { %v132_v28 = vld [vmem:[#allocation2] sm:$0xff] }
 0x12f   :  { %v124_v22 = vpop.f32.mrf.mxu1 }
 0x130   :  { %v127_v23 = vmul.f32 %v189_v17, %v124_v22 }
 0x132   :  { %v128_v24 = vadd.f32 %v127_v23, %v105_v21 }
 0x134   :  { %v129_v25 = vmul.f32 0.5, %v128_v24 }
 0x136   :  { %130 = vst [vmem:[#allocation2 + $0x8] sm:$0xf] %v129_v25 }
 0x13d   :  { %v133_v26 = vld [vmem:[#allocation2 + $0x8] sm:$0xf] }
 0x13e   :  { %181 = vmatpush.msk.msra.mxu2 %vm138_vm0, %v133_v26 }
 0x140   :  { %157 = vmatpush.msra.mxu2 %v132_v28 }
 0x141   :  { %182 = vmatmul.msk.f32.vlgmr.msra.gmra.mxu2 %vm134_vm1, %v131_v27 }
 0x1c4   :  { %v159_v29 = vpop.f32.mrf.mxu2 }
 0x1c5   :  { %162 = vst [vmem:[#allocation9] sm:$0xff] %v159_v29 }
 0x1c6   :  { %173 = dma.vmem_to_hbm [thread:$0]  %s169_s5, 128, %s171_s8, [#allocation5]  }
 0x1c7   :  { %290 = dma.done.wait [#allocation5], 128  }
 0x1c8   :  { %291 = vsyncadd [#allocation5], 4294967168 }
 0x1c9   :  { %178 = vsyncpa [#allocation4], 1 }
 0x1ca   :  { %179 = vsyncpa [#allocation7], 1 }
 0x1cb   :  { %180 = vsyncpa [#allocation5], 1 }

</bundles_post_ra>
